<compile_context>
chip_gen: v7x
topology: tpu7x:2x2x1
jax: 0.10.0
libtpu: 0.0.40
codegen_flags: <defaults>
</compile_context>

<pallas_src>
import functools

import jax
import jax.numpy as jnp
from jax import lax
from jax.experimental import pallas as pl
from jax.experimental.pallas import tpu as pltpu


def _round_up(x, m):
    return ((x + m - 1) // m) * m


def attention_kernel(feat_ref, dec_ref, uw_ref, bias_ref, ww_ref, aw_ref,
                     ab_ref, ctx_ref, attn_ref, *, l_valid):
    tb, ls, ep = feat_ref.shape
    ap = uw_ref.shape[1]
    lo = attn_ref.shape[-1]

    feat = feat_ref[...]                        # (TB, LS, EP): EP lane-dense
    feat2 = feat.reshape(tb * ls, ep)           # layout-free: LS % 8 == 0, EP % 128 == 0

    # enc_U: one collapsed (TB*LS, EP) @ (EP, AP) MXU matmul, f32 accumulation.
    enc = jnp.dot(feat2, uw_ref[...], preferred_element_type=jnp.float32)
    enc = enc.reshape(tb, ls, ap)               # (TB, LS, AP)

    # dec_W; the enc_U + dec_W Linear biases are pre-folded into bias_ref (1, AP).
    dec_att = jnp.dot(dec_ref[...], ww_ref[...], preferred_element_type=jnp.float32)
    dec_att = dec_att + bias_ref[...]           # (TB, AP)

    combined = jnp.tanh(enc + dec_att[:, None, :])   # (TB, LS, AP), EUP tanh

    # full_A reduction over A. AP is lane-padded to one 128-wide stripe and the
    # softmax needs scores lane-major along L, so an MXU (.,AP)@(AP,1) dot would
    # only add a sublane->lane relayout of its N=1 result; the VPU multiply +
    # lane reduce is the cheaper form here and keeps the MXU free.
    scores = jnp.sum(combined * aw_ref[...][None, :, :], axis=-1) + ab_ref[...]  # (TB, LS)

    # Mask sublane-padded L positions before the softmax (their weight -> 0 exactly).
    if ls > l_valid:
        lane = lax.broadcasted_iota(jnp.int32, (tb, ls), 1)
        scores = jnp.where(lane < l_valid, scores, -jnp.inf)

    # Numerically stable softmax over L; approx reciprocal runs on the EUP, one
    # Newton step restores f32-grade accuracy for the 1e-5 check.
    m = jnp.max(scores, axis=-1, keepdims=True)
    e = jnp.exp(scores - m)
    s = jnp.sum(e, axis=-1, keepdims=True)
    r = pl.reciprocal(s, approx=True)
    r = r * (2.0 - s * r)
    w = e * r                                   # (TB, LS)

    # context = sum_l w[b,l] * feat[b,l,:] on the VPU over the resident features
    # tile (no per-batch M=1 MXU matmuls; the kernel is HBM-bound so this extra
    # VPU pass is effectively free).
    ctx = jnp.sum(w[:, :, None] * feat, axis=1)        # (TB, EP)
    ctx_ref[...] = ctx.astype(ctx_ref.dtype)

    # Lane-dense attention store: pad L lanes up to LO (post-softmax, exact;
    # no-op when LS is already 128-aligned).
    if lo > ls:
        w = jnp.concatenate([w, jnp.zeros((tb, lo - ls), w.dtype)], axis=-1)
    attn_ref[...] = w.astype(attn_ref.dtype)


def _pick_block_b(batch, ls, ep, dp, ap, lo, vmem_limit):
    """Largest legal batch tile whose estimated footprint fits the VMEM budget."""
    def footprint(bb):
        return 4 * (2 * bb * ls * ep            # features tile (double-buffered)
                    + 2 * bb * dp               # decoder tile
                    + 2 * bb * (ep + lo)        # output tiles
                    + 3 * bb * ls * ap          # enc / combined / score temporaries
                    + bb * ls * ep              # context broadcast-multiply temp
                    + (ep + dp + 2) * ap + 8 * 128)   # resident weights + biases

    cands = sorted({batch} | {d for d in range(8, batch, 8) if batch % d == 0},
                   reverse=True)
    fitting = [bb for bb in cands if footprint(bb) <= int(vmem_limit * 0.75)]
    if not fitting:
        # TODO(synk): flash-style online softmax over L tiles (running max/sum +
        # context accumulator finalized with pl.when) for very long sequences;
        # here one batch row's (L, E) slab must fit in VMEM.
        return cands[-1]
    multi = [bb for bb in fitting if batch // bb >= 2]   # keep >=2 grid steps (v7x: 2 TCs)
    return multi[0] if multi else fitting[0]


def attention_forward(features, dec_hidden, params, *, block_b=None):
    """features: (B, L, E); dec_hidden: (B, D). Returns (context (B, E), attn (B, L))."""
    B, L, E = features.shape
    D = dec_hidden.shape[1]
    uw_t, ub, ww_t, wb, aw, ab = params   # (E,A), (1,A), (D,A), (1,A), (1,A), (1,1)
    A = uw_t.shape[1]

    LS = _round_up(L, 8)       # sublane-dense L (features / softmax working width)
    EP = _round_up(E, 128)     # lane-dense E
    DP = _round_up(D, 128)     # lane-dense D
    AP = _round_up(A, 128)     # lane-dense A
    LO = _round_up(LS, 128)    # lane-dense attention-output width

    # One-time wrapper-side zero padding (exact math): padded A columns give
    # tanh(0)*0 -> 0 score contribution, padded E/D entries only multiply
    # zeros, padded L rows are masked to -inf before the softmax in-kernel.
    feat_p = jnp.pad(features, ((0, 0), (0, LS - L), (0, EP - E)))
    dec_p = jnp.pad(dec_hidden, ((0, 0), (0, DP - D)))
    uw_p = jnp.pad(uw_t, ((0, EP - E), (0, AP - A)))
    ww_p = jnp.pad(ww_t, ((0, DP - D), (0, AP - A)))
    bias_p = jnp.pad(ub + wb, ((0, 0), (0, AP - A)))   # folded Linear biases
    aw_p = jnp.pad(aw, ((0, 0), (0, AP - A)))

    # Per-generation VMEM budget: v7x (64 MiB physical) -> 32 MiB limit,
    # v5e/v6e (128 MiB) -> 64 MiB limit.
    try:
        vmem_cap = pltpu.get_tpu_info().vmem_capacity_bytes
    except Exception:
        vmem_cap = 64 * 1024 * 1024
    vmem_limit = min(max(vmem_cap // 2, 32 * 1024 * 1024), 100 * 1024 * 1024)

    legal = (block_b is not None and B % block_b == 0
             and (block_b % 8 == 0 or block_b == B))
    if not legal:
        block_b = _pick_block_b(B, LS, EP, DP, AP, LO, vmem_limit)
    grid_b = B // block_b

    kernel = functools.partial(attention_kernel, l_valid=L)
    const = lambda shape: pl.BlockSpec(shape, lambda b: tuple(0 for _ in shape))

    ctx_p, attn_p = pl.pallas_call(
        kernel,
        out_shape=(
            jax.ShapeDtypeStruct((B, EP), features.dtype),
            jax.ShapeDtypeStruct((B, LO), features.dtype),
        ),
        grid_spec=pltpu.PrefetchScalarGridSpec(
            num_scalar_prefetch=0,
            grid=(grid_b,),
            in_specs=[
                pl.BlockSpec((block_b, LS, EP), lambda b: (b, 0, 0)),   # features
                pl.BlockSpec((block_b, DP), lambda b: (b, 0)),          # decoder state
                const((EP, AP)),     # enc_U weight (transposed), VMEM-resident
                const((1, AP)),      # folded enc_U + dec_W bias
                const((DP, AP)),     # dec_W weight (transposed), VMEM-resident
                const((1, AP)),      # full_A weight (row vector)
                const((1, 1)),       # full_A bias
            ],
            out_specs=[
                pl.BlockSpec((block_b, EP), lambda b: (b, 0)),
                pl.BlockSpec((block_b, LO), lambda b: (b, 0)),
            ],
        ),
        compiler_params=pltpu.CompilerParams(
            dimension_semantics=("parallel",),    # v7x: shard batch over 2 TCs
            vmem_limit_bytes=vmem_limit,
        ),
    )(feat_p, dec_p, uw_p, bias_p, ww_p, aw_p, ab)

    # TODO(synk): bf16 feature/U/W feed on v6e/v7x (halves HBM bytes) left out
    # to preserve the f32 1e-5 correctness check.
    return ctx_p[:, :E], attn_p[:, :L]


def init_params(key, enc_hidden, dec_hidden, attn_size):
    """Matches nn.Linear's uniform(-1/sqrt(fan_in), +1/sqrt(fan_in)) init."""
    ks = jax.random.split(key, 6)

    def lin(kw, kb, fan_in, fan_out):
        bound = 1.0 / jnp.sqrt(fan_in)
        w = jax.random.uniform(kw, (fan_in, fan_out), jnp.float32, -bound, bound)
        b = jax.random.uniform(kb, (1, fan_out), jnp.float32, -bound, bound)
        return w, b

    uw_t, ub = lin(ks[0], ks[1], enc_hidden, attn_size)   # enc_U
    ww_t, wb = lin(ks[2], ks[3], dec_hidden, attn_size)   # dec_W
    aw_t, ab = lin(ks[4], ks[5], attn_size, 1)            # full_A
    aw = aw_t.T                                           # (1, attn_size)
    return uw_t, ub, ww_t, wb, aw, ab


def attention_reference(features, dec_hidden, params):
    uw_t, ub, ww_t, wb, aw, ab = params
    enc_att = features @ uw_t + ub[None, :, :]
    dec_att = dec_hidden @ ww_t + wb
    combined = jnp.tanh(enc_att + dec_att[:, None, :])
    scores = jnp.sum(combined * aw[None, :, :], axis=-1) + ab
    w = jax.nn.softmax(scores, axis=1)
    # == torch.sum(attn_weight.unsqueeze(2) * features, dim=1)
    ctx = jnp.einsum("bl,ble->be", w, features)
    return ctx, w


if __name__ == "__main__":
    B, L = 2, 8
    enc_hidden, dec_hidden, attn_size = 32, 32, 32

    key = jax.random.PRNGKey(0)
    k_feat, k_dec, k_params = jax.random.split(key, 3)

    features = jax.random.normal(k_feat, (B, L, enc_hidden), jnp.float32)
    dec_state = jax.random.normal(k_dec, (B, dec_hidden), jnp.float32)
    params = init_params(k_params, enc_hidden, dec_hidden, attn_size)

    ctx, attn_w = attention_forward(features, dec_state, params)
    ctx = jax.block_until_ready(ctx)
    attn_w = jax.block_until_ready(attn_w)

    ctx_ref, attn_ref = attention_reference(features, dec_state, params)
    assert ctx.shape == (B, enc_hidden) and attn_w.shape == (B, L)
    assert jnp.allclose(ctx, ctx_ref, atol=1e-5, rtol=1e-5)
    assert jnp.allclose(attn_w, attn_ref, atol=1e-5, rtol=1e-5)

    print("KERNEL_OK")
</pallas_src>

<mosaic_0001>
module attributes {stable_mosaic.version = 11 : i64} {
  func.func @attention_kernel(%arg0: i32, %arg1: memref<2x8x128xf32, #tpu.memory_space<vmem>>, %arg2: memref<2x128xf32, #tpu.memory_space<vmem>>, %arg3: memref<128x128xf32, #tpu.memory_space<vmem>>, %arg4: memref<1x128xf32, #tpu.memory_space<vmem>>, %arg5: memref<128x128xf32, #tpu.memory_space<vmem>>, %arg6: memref<1x128xf32, #tpu.memory_space<vmem>>, %arg7: memref<1x1xf32, #tpu.memory_space<vmem>>, %arg8: memref<2x128xf32, #tpu.memory_space<vmem>>, %arg9: memref<2x128xf32, #tpu.memory_space<vmem>>) attributes {dimension_semantics = [#tpu.dimension_semantics<parallel>], iteration_bounds = array<i64: 1>, scalar_prefetch = 0 : i64, scratch_operands = 0 : i64, tpu.core_type = #tpu.core_type<tc>, window_params = [{transform_indices = @transform_0, window_bounds = array<i64: 2, 8, 128>}, {transform_indices = @transform_1, window_bounds = array<i64: 2, 128>}, {pipeline_mode = #tpu.pipeline_mode<synchronous>, transform_indices = @transform_2, window_bounds = array<i64: 128, 128>}, {pipeline_mode = #tpu.pipeline_mode<synchronous>, transform_indices = @transform_3, window_bounds = array<i64: 1, 128>}, {pipeline_mode = #tpu.pipeline_mode<synchronous>, transform_indices = @transform_4, window_bounds = array<i64: 128, 128>}, {pipeline_mode = #tpu.pipeline_mode<synchronous>, transform_indices = @transform_5, window_bounds = array<i64: 1, 128>}, {pipeline_mode = #tpu.pipeline_mode<synchronous>, transform_indices = @transform_6, window_bounds = array<i64: 1, 1>}, {transform_indices = @transform_7, window_bounds = array<i64: 2, 128>}, {transform_indices = @transform_8, window_bounds = array<i64: 2, 128>}]} {
    %c0 = arith.constant 0 : index
    %c0_0 = arith.constant 0 : index
    %c0_1 = arith.constant 0 : index
    %0 = vector.load %arg1[%c0, %c0_0, %c0_1] : memref<2x8x128xf32, #tpu.memory_space<vmem>>, vector<2x8x128xf32>
    %1 = vector.shape_cast %0 : vector<2x8x128xf32> to vector<16x128xf32>
    %c0_2 = arith.constant 0 : index
    %c0_3 = arith.constant 0 : index
    %2 = vector.load %arg3[%c0_2, %c0_3] : memref<128x128xf32, #tpu.memory_space<vmem>>, vector<128x128xf32>
    %cst = arith.constant dense<0.000000e+00> : vector<16x128xf32>
    %3 = tpu.matmul %1, %2, %cst {dimension_numbers = #tpu.dot_dimension_numbers<[1], [0], [0], [1], [0, 0, 1, 1], [], []>} : vector<16x128xf32>, vector<128x128xf32>, vector<16x128xf32> -> vector<16x128xf32>
    %4 = vector.shape_cast %3 : vector<16x128xf32> to vector<2x8x128xf32>
    %c0_4 = arith.constant 0 : index
    %c0_5 = arith.constant 0 : index
    %5 = vector.load %arg2[%c0_4, %c0_5] : memref<2x128xf32, #tpu.memory_space<vmem>>, vector<2x128xf32>
    %c0_6 = arith.constant 0 : index
    %c0_7 = arith.constant 0 : index
    %6 = vector.load %arg5[%c0_6, %c0_7] : memref<128x128xf32, #tpu.memory_space<vmem>>, vector<128x128xf32>
    %cst_8 = arith.constant dense<0.000000e+00> : vector<2x128xf32>
    %7 = tpu.matmul %5, %6, %cst_8 {dimension_numbers = #tpu.dot_dimension_numbers<[1], [0], [0], [1], [0, 0, 1, 1], [], []>} : vector<2x128xf32>, vector<128x128xf32>, vector<2x128xf32> -> vector<2x128xf32>
    %c0_9 = arith.constant 0 : index
    %c0_10 = arith.constant 0 : index
    %8 = vector.load %arg4[%c0_9, %c0_10] : memref<1x128xf32, #tpu.memory_space<vmem>>, vector<1x128xf32>
    %9 = vector.broadcast %8 : vector<1x128xf32> to vector<2x128xf32>
    %10 = arith.addf %7, %9 : vector<2x128xf32>
    %11 = vector.shape_cast %10 : vector<2x128xf32> to vector<2x1x128xf32>
    %12 = vector.broadcast %11 : vector<2x1x128xf32> to vector<2x8x128xf32>
    %13 = arith.addf %4, %12 : vector<2x8x128xf32>
    %14 = math.tanh %13 : vector<2x8x128xf32>
    %c0_11 = arith.constant 0 : index
    %c0_12 = arith.constant 0 : index
    %15 = vector.load %arg6[%c0_11, %c0_12] : memref<1x128xf32, #tpu.memory_space<vmem>>, vector<1x128xf32>
    %16 = vector.shape_cast %15 : vector<1x128xf32> to vector<1x1x128xf32>
    %17 = vector.broadcast %16 : vector<1x1x128xf32> to vector<2x8x128xf32>
    %18 = arith.mulf %14, %17 : vector<2x8x128xf32>
    %cst_13 = arith.constant dense<0.000000e+00> : vector<2x8xf32>
    %19 = vector.multi_reduction <add>, %18, %cst_13 [2] : vector<2x8x128xf32> to vector<2x8xf32>
    %c0_14 = arith.constant 0 : index
    %c0_15 = arith.constant 0 : index
    %20 = vector.load %arg7[%c0_14, %c0_15] : memref<1x1xf32, #tpu.memory_space<vmem>>, vector<1x1xf32>
    %21 = vector.broadcast %20 : vector<1x1xf32> to vector<2x8xf32>
    %22 = arith.addf %19, %21 : vector<2x8xf32>
    %cst_16 = arith.constant dense<0xFF800000> : vector<2xf32>
    %23 = vector.multi_reduction <maximumf>, %22, %cst_16 [1] : vector<2x8xf32> to vector<2xf32>
    %24 = vector.shape_cast %23 : vector<2xf32> to vector<2x1xf32>
    %25 = vector.broadcast %24 : vector<2x1xf32> to vector<2x8xf32>
    %26 = arith.subf %22, %25 : vector<2x8xf32>
    %27 = math.exp %26 : vector<2x8xf32>
    %cst_17 = arith.constant dense<0.000000e+00> : vector<2xf32>
    %28 = vector.multi_reduction <add>, %27, %cst_17 [1] : vector<2x8xf32> to vector<2xf32>
    %29 = vector.shape_cast %28 : vector<2xf32> to vector<2x1xf32>
    %30 = tpu.reciprocal %29 {approx = true} : vector<2x1xf32> -> vector<2x1xf32>
    %31 = arith.mulf %29, %30 : vector<2x1xf32>
    %cst_18 = arith.constant 2.000000e+00 : f32
    %32 = vector.broadcast %cst_18 : f32 to vector<2x1xf32>
    %33 = arith.subf %32, %31 : vector<2x1xf32>
    %34 = arith.mulf %30, %33 : vector<2x1xf32>
    %35 = vector.broadcast %34 : vector<2x1xf32> to vector<2x8xf32>
    %36 = arith.mulf %27, %35 : vector<2x8xf32>
    %37 = vector.shape_cast %36 : vector<2x8xf32> to vector<2x8x1xf32>
    %38 = vector.broadcast %37 : vector<2x8x1xf32> to vector<2x8x128xf32>
    %39 = arith.mulf %38, %0 : vector<2x8x128xf32>
    %cst_19 = arith.constant dense<0.000000e+00> : vector<2x128xf32>
    %40 = vector.multi_reduction <add>, %39, %cst_19 [1] : vector<2x8x128xf32> to vector<2x128xf32>
    %c0_20 = arith.constant 0 : index
    %c0_21 = arith.constant 0 : index
    %41 = vector.load %arg8[%c0_20, %c0_21] : memref<2x128xf32, #tpu.memory_space<vmem>>, vector<2x128xf32>
    tpu.vector_store %arg8[%c0_20, %c0_21], %40 {strides = array<i32>} : memref<2x128xf32, #tpu.memory_space<vmem>>, vector<2x128xf32>,
    %cst_22 = arith.constant 0.000000e+00 : f32
    %42 = vector.broadcast %cst_22 : f32 to vector<2x120xf32>
    %43 = tpu.concatenate %36, %42 in 1 : vector<2x8xf32>, vector<2x120xf32> -> vector<2x128xf32>
    %c0_23 = arith.constant 0 : index
    %c0_24 = arith.constant 0 : index
    %44 = vector.load %arg9[%c0_23, %c0_24] : memref<2x128xf32, #tpu.memory_space<vmem>>, vector<2x128xf32>
    tpu.vector_store %arg9[%c0_23, %c0_24], %43 {strides = array<i32>} : memref<2x128xf32, #tpu.memory_space<vmem>>, vector<2x128xf32>,
    return
  }
  func.func @transform_0(%arg0: i32) -> (i32, i32, i32) {
    %c0_i32 = arith.constant 0 : i32
    %c0_i32_0 = arith.constant 0 : i32
    %c0_i32_1 = arith.constant 0 : i32
    return %arg0, %c0_i32, %c0_i32_0 : i32, i32, i32
  }
  func.func @transform_1(%arg0: i32) -> (i32, i32) {
    %c0_i32 = arith.constant 0 : i32
    %c0_i32_0 = arith.constant 0 : i32
    return %arg0, %c0_i32 : i32, i32
  }
  func.func @transform_2(%arg0: i32) -> (i32, i32) {
    %c0_i32 = arith.constant 0 : i32
    %c0_i32_0 = arith.constant 0 : i32
    %c0_i32_1 = arith.constant 0 : i32
    return %c0_i32, %c0_i32_0 : i32, i32
  }
  func.func @transform_3(%arg0: i32) -> (i32, i32) {
    %c0_i32 = arith.constant 0 : i32
    %c0_i32_0 = arith.constant 0 : i32
    %c0_i32_1 = arith.constant 0 : i32
    return %c0_i32, %c0_i32_0 : i32, i32
  }
  func.func @transform_4(%arg0: i32) -> (i32, i32) {
    %c0_i32 = arith.constant 0 : i32
    %c0_i32_0 = arith.constant 0 : i32
    %c0_i32_1 = arith.constant 0 : i32
    return %c0_i32, %c0_i32_0 : i32, i32
  }
  func.func @transform_5(%arg0: i32) -> (i32, i32) {
    %c0_i32 = arith.constant 0 : i32
    %c0_i32_0 = arith.constant 0 : i32
    %c0_i32_1 = arith.constant 0 : i32
    return %c0_i32, %c0_i32_0 : i32, i32
  }
  func.func @transform_6(%arg0: i32) -> (i32, i32) {
    %c0_i32 = arith.constant 0 : i32
    %c0_i32_0 = arith.constant 0 : i32
    %c0_i32_1 = arith.constant 0 : i32
    return %c0_i32, %c0_i32_0 : i32, i32
  }
  func.func @transform_7(%arg0: i32) -> (i32, i32) {
    %c0_i32 = arith.constant 0 : i32
    %c0_i32_0 = arith.constant 0 : i32
    return %arg0, %c0_i32 : i32, i32
  }
  func.func @transform_8(%arg0: i32) -> (i32, i32) {
    %c0_i32 = arith.constant 0 : i32
    %c0_i32_0 = arith.constant 0 : i32
    return %arg0, %c0_i32 : i32, i32
  }
}

</mosaic_0001>

<bundles_post_ra>
// kernel: tpu_custom_call.1
= control target key start
LH: loop header
LB: loop body
LE: loop exit
PB: predicated region body
PF: predicated region fallthrough
CT: control target
= control target key end

     0   :  { %s947_s0 = inlined_call_operand.hbm [shape: f32[2,8,128], index: 0, kind: input, shape index: {}]   ;;  %s948_s1 = inlined_call_operand.vmem [shape: f32[2,128], index: 1, kind: input, shape index: {}]   ;;  %s949_s2 = inlined_call_operand.hbm [shape: f32[128,128], index: 2, kind: input, shape index: {}]   ;;  %s950_s3 = inlined_call_operand.vmem [shape: f32[1,128], index: 3, kind: input, shape index: {}]   ;;  %s951_s4 = inlined_call_operand.hbm [shape: f32[128,128], index: 4, kind: input, shape index: {}]   ;;  %s952_s5 = inlined_call_operand.vmem [shape: f32[1,128], index: 5, kind: input, shape index: {}]   ;;  %s953_s6 = inlined_call_operand.<no memory space> [shape: f32[1,1], index: 6, kind: input, shape index: {}]   ;;  %s954_s7 = inlined_call_operand.hbm [shape: f32[2,128], index: 7, kind: output, shape index: {0}]   ;;  %s955_s8 = inlined_call_operand.hbm [shape: f32[2,128], index: 8, kind: output, shape index: {1}]  }
   0x1   :  { %v14_v0 = vstv %s953_s6 }
   0x2   :  { %15 = vst [vmem:[#allocation2] sm:$0x1] %v14_v0 }
   0x3   :  { %16 = vsyncpa [#allocation4], 0 }
   0x4   :  { %17 = vsyncpa [#allocation7], 0 }
   0x5   :  { %18 = vsyncpa [#allocation5], 0 }
   0x6   :  { %19 = vsyncpa [#allocation11], 0  ;;  %s774_s29 = smov [#allocation6]   ;;  %s775_s9 = smov [#allocation3]  }
   0x7   :  { %s39_s30 = sshll.u32 %s774_s29, 4  ;;  %s25_s10 = sshll.u32 %s775_s9, 4  ;;  %s40_s30 = int_to_ptr.vmem [resolvable:$true] %s39_s30  ;;  %s834_s10 = int_to_ptr.vmem [resolvable:$true] %s25_s10 }
   0x8   :  { %s656_s13 = scalar_lea.hbm %s949_s2, 2048 }
   0x9   :  { %p657_p0 = scmp.ne.s32.totalorder %s949_s2, %s656_s13  ;;  %p660_p1 = scmp.lt.u32.totalorder %s656_s13, %s949_s2 }
   0xb   :  { %p662_p2 = pnand %p660_p1, %p657_p0 }
   0xd   :  { %665 = shalt.err (!%p662_p2)
}
   0xe   :  { %s666_s17 = scalar_lea.vmem %s40_s30, 2048  ;;  %p671_p4 = scmp.lt.s32.totalorder %s40_s30, %s40_s30 }
   0xf   :  { %p667_p3 = scmp.ne.s32.totalorder %s40_s30, %s666_s17  ;;  %p672_p5 = scmp.lt.s32.totalorder %s666_s17, %s666_s17 }
  0x11   :  { %p673_p6 = por %p672_p5, %p671_p4 }
  0x13   :  { %p674_p7 = pnand %p673_p6, %p667_p3 }
  0x15   :  { %677 = shalt.err (!%p674_p7)
}
  0x16   :  { %s776_s18 = smov 128   ;;  %s777_s19 = smov 8  }
  0x17   :  { %45 = dma.hbm_to_vmem [thread:$0]  %s949_s2, 2048, %s40_s30, [#allocation7], %s776_s18, %s776_s18, %s777_s19  }
  0x18   :  { %s678_s24 = scalar_lea.hbm %s947_s0, 256 }
  0x19   :  { %p679_p8 = scmp.ne.s32.totalorder %s947_s0, %s678_s24  ;;  %p682_p9 = scmp.lt.u32.totalorder %s678_s24, %s947_s0 }
  0x1b   :  { %p684_p10 = pnand %p682_p9, %p679_p8 }
  0x1d   :  { %687 = shalt.err (!%p684_p10)
}
  0x1e   :  { %s688_s29 = scalar_lea.vmem %s834_s10, 256  ;;  %p693_p12 = scmp.lt.s32.totalorder %s834_s10, %s834_s10 }
  0x1f   :  { %p689_p11 = scmp.ne.s32.totalorder %s834_s10, %s688_s29  ;;  %p694_p13 = scmp.lt.s32.totalorder %s688_s29, %s688_s29 }
  0x21   :  { %p695_p0 = por %p694_p13, %p693_p12 }
  0x23   :  { %p696_p1 = pnand %p695_p0, %p689_p11 }
  0x25   :  { %699 = shalt.err (!%p696_p1)
}
  0x26   :  { %31 = dma.hbm_to_vmem [thread:$0]  %s947_s0, 256, %s834_s10, [#allocation4], %s776_s18, %s776_s18, %s777_s19  }
  0x27   :  { %s778_s9 = smov [#allocation8]   ;;  %s700_s14 = scalar_lea.hbm %s951_s4, 2048 }
  0x28   :  { %s53_s11 = sshll.u32 %s778_s9, 4  ;;  %p701_p2 = scmp.ne.s32.totalorder %s951_s4, %s700_s14  ;;  %s54_s11 = int_to_ptr.vmem [resolvable:$true] %s53_s11 }
  0x29   :  { %p704_p3 = scmp.lt.u32.totalorder %s700_s14, %s951_s4 }
  0x2b   :  { %p706_p4 = pnand %p704_p3, %p701_p2 }
  0x2d   :  { %709 = shalt.err (!%p706_p4)
}
  0x2e   :  { %s710_s20 = scalar_lea.vmem %s54_s11, 2048  ;;  %p715_p6 = scmp.lt.s32.totalorder %s54_s11, %s54_s11 }
  0x2f   :  { %p711_p5 = scmp.ne.s32.totalorder %s54_s11, %s710_s20  ;;  %p716_p7 = scmp.lt.s32.totalorder %s710_s20, %s710_s20 }
  0x31   :  { %p717_p8 = por %p716_p7, %p715_p6 }
  0x33   :  { %p718_p9 = pnand %p717_p8, %p711_p5 }
  0x35   :  { %721 = shalt.err (!%p718_p9)
}
  0x36   :  { %59 = dma.hbm_to_vmem [thread:$0]  %s951_s4, 2048, %s54_s11, [#allocation7], %s776_s18, %s776_s18, %s777_s19  }
  0x37   :  { %766 = dma.done.wait [#allocation4], 256  }
  0x38   :  { %767 = vsyncadd [#allocation4], 4294967040 }
  0x39   :  { %768 = dma.done.wait [#allocation7], 4096  }
  0x3a   :  { %769 = vsyncadd [#allocation7], 4294963200  ;;  %v779_v1 = vmov 0.0|0.0   ;;  %vm780_vm0 = vmmov 0   ;;  %v781_v2 = vmov 0.0   ;;  %v167_v3 = vld [vmem:[#allocation8] sm:$0xff]  ;;  %v264_v58 = vlaneseq }
  0x3b   :  { %608 = vmatprep.subr.bf16.mxu1 %v779_v1  ;;  %573 = vmatprep.mubr.msk.f32.mxu1 %vm780_vm0, %v781_v2  ;;  %v168_v4 = vld [vmem:[#allocation8 + $0x8] sm:$0xff]  ;;  %v169_v5 = vld [vmem:[#allocation8 + $0x10] sm:$0xff]  ;;  %v170_v7 = vld [vmem:[#allocation8 + $0x18] sm:$0xff]  ;;  %v782_v55 = vmov 0   ;;  %v783_v56 = vmov 1966171168  }
  0x3c   :  { %v609_v6 = vpack.c.bf16 %v168_v4, %v167_v3  ;;  %v75_v8 = vld [vmem:[#allocation6] sm:$0xff]  ;;  %v76_v9 = vld [vmem:[#allocation6 + $0x8] sm:$0xff]  ;;  %v77_v11 = vld [vmem:[#allocation6 + $0x10] sm:$0xff]  ;;  %v612_v12 = vpack.c.bf16 %v170_v7, %v169_v5  ;;  %644 = vset.pattern.permute.xlu1 %v782_v55  ;;  %645 = vset.pattern.permute.xlu0 %v782_v55  ;;  %v262_v57 = vunpack.c.l.s4 %v783_v56  ;;  %v903_v60 = vshrl.u32 %v264_v58, 7 }
  0x3d   :  { %v576_v10 = vpack.c.bf16 %v76_v9, %v75_v8  ;;  %v171_v13 = vld [vmem:[#allocation8 + $0x20] sm:$0xff]  ;;  %v78_v14 = vld [vmem:[#allocation6 + $0x18] sm:$0xff]  ;;  %v172_v15 = vld [vmem:[#allocation8 + $0x28] sm:$0xff]  ;;  %vm334_vm1 = vcmask 1041409   ;;  %vm337_vm2 = vcmask 58368   ;;  %vm435_vm3 = vcmask 64512  }
  0x3e   :  { %610 = vmatpush3.bf16.msra.mxu1 %v609_v6  ;;  %v580_v16 = vpack.c.bf16 %v78_v14, %v77_v11  ;;  %v79_v17 = vld [vmem:[#allocation6 + $0x20] sm:$0xff]  ;;  %v80_v18 = vld [vmem:[#allocation6 + $0x28] sm:$0xff]  ;;  %v615_v20 = vpack.c.bf16 %v172_v15, %v171_v13  ;;  %v81_v21 = vld [vmem:[#allocation6 + $0x30] sm:$0xff]  ;;  %v263_v59 = vunpack.c.0.s8 %v262_v57  ;;  %v285_v4 = vsub.s32 0, %v903_v60 }
  0x3f   :  { %611 = vmatprep.subr.bf16.mxu1 %v779_v1  ;;  %577 = vmatprep.subr.bf16.mxu0 %v576_v10  ;;  %v584_v19 = vpack.c.bf16 %v80_v18, %v79_v17  ;;  %v82_v22 = vld [vmem:[#allocation6 + $0x38] sm:$0xff]  ;;  %v173_v23 = vld [vmem:[#allocation8 + $0x30] sm:$0xff]  ;;  %v83_v27 = vld [vmem:[#allocation6 + $0x40] sm:$0xff]  ;;  %v325_v18 = vand.u32 127, %v264_v58 }
  0x40   :  { %579 = vmatpush3.bf16.msra.mxu0 %v576_v10  ;;  %v174_v24 = vld [vmem:[#allocation8 + $0x38] sm:$0xff]  ;;  %v588_v25 = vpack.c.bf16 %v82_v22, %v81_v21  ;;  %v84_v28 = vld [vmem:[#allocation6 + $0x48] sm:$0xff]  ;;  %v889_v29 = vld [vmem:[#allocation3] sm:$0xff]  ;;  %v266_v62 = vsub.s32 %v263_v59, %v903_v60 }
  0x41   :  { %581 = vmatprep.subr.bf16.mxu0 %v580_v16  ;;  %v618_v26 = vpack.c.bf16 %v174_v24, %v173_v23  ;;  %v175_v30 = vld [vmem:[#allocation8 + $0x40] sm:$0xff]  ;;  %v176_v31 = vld [vmem:[#allocation8 + $0x48] sm:$0xff]  ;;  %538 = vmatprep.mubr.f32.mxu0 %v889_v29  ;;  %v592_v32 = vpack.c.bf16 %v84_v28, %v83_v27  ;;  %v85_v34 = vld [vmem:[#allocation6 + $0x50] sm:$0xff]  ;;  %v328_v21 = vsub.s32 %v325_v18, %v903_v60 }
  0x42   :  { %613 = vmatpush3.bf16.msra.mxu1 %v612_v12  ;;  %v621_v33 = vpack.c.bf16 %v176_v31, %v175_v30  ;;  %v86_v35 = vld [vmem:[#allocation6 + $0x58] sm:$0xff]  ;;  %v177_v36 = vld [vmem:[#allocation8 + $0x50] sm:$0xff]  ;;  %v87_v40 = vld [vmem:[#allocation6 + $0x60] sm:$0xff]  ;;  %v348_v30 = vsub.s32 1, %v903_v60 }
  0x43   :  { %614 = vmatprep.subr.bf16.mxu1 %v779_v1  ;;  %v178_v37 = vld [vmem:[#allocation8 + $0x58] sm:$0xff]  ;;  %v596_v38 = vpack.c.bf16 %v86_v35, %v85_v34  ;;  %v88_v41 = vld [vmem:[#allocation6 + $0x68] sm:$0xff]  ;;  %v179_v42 = vld [vmem:[#allocation8 + $0x60] sm:$0xff] }
  0x44   :  { %583 = vmatpush3.bf16.msra.mxu0 %v580_v16  ;;  %v624_v39 = vpack.c.bf16 %v178_v37, %v177_v36  ;;  %v180_v43 = vld [vmem:[#allocation8 + $0x68] sm:$0xff]  ;;  %v600_v44 = vpack.c.bf16 %v88_v41, %v87_v40  ;;  %v89_v46 = vld [vmem:[#allocation6 + $0x70] sm:$0xff]  ;;  %v90_v47 = vld [vmem:[#allocation6 + $0x78] sm:$0xff] }
  0x45   :  { %585 = vmatprep.subr.bf16.mxu0 %v584_v19  ;;  %v627_v45 = vpack.c.bf16 %v180_v43, %v179_v42  ;;  %v181_v48 = vld [vmem:[#allocation8 + $0x70] sm:$0xff]  ;;  %v182_v49 = vld [vmem:[#allocation8 + $0x78] sm:$0xff]  ;;  %v604_v50 = vpack.c.bf16 %v90_v47, %v89_v46  ;;  %v470_v54 = vld [vmem:[#allocation2] ss:$0 sm:$0xff] }
  0x46   :  { %616 = vmatpush3.bf16.msra.mxu1 %v615_v20  ;;  %v630_v51 = vpack.c.bf16 %v182_v49, %v181_v48  ;;  %v166_v52 = vld [vmem:[%s948_s1] sm:$0x3]  ;;  %v900_v53 = vld [vmem:[#allocation3 + $0x8] sm:$0xff]  ;;  %317 = vperm.xlu1 %644, %v470_v54  }
  0x47   :  { %617 = vmatprep.subr.bf16.mxu1 %v779_v1  ;;  %v468_v61 = vld [vmem:[%s950_s3] ss:$0 sm:$0xff] }
  0x48   :  { %587 = vmatpush3.bf16.msra.mxu0 %v584_v19  ;;  %v469_v13 = vld [vmem:[%s952_s5] ss:$0 sm:$0xff]  ;;  %s784_s5 = smov [#allocation10]  }
  0x49   :  { %589 = vmatprep.subr.bf16.mxu0 %v588_v25  ;;  %s454_s22 = sshll.u32 %s784_s5, 4  ;;  %s455_s22 = int_to_ptr.vmem [resolvable:$true] %s454_s22 }
  0x4a   :  { %619 = vmatpush3.bf16.msra.mxu1 %v618_v26  ;;  %s722_s23 = scalar_lea.vmem %s455_s22, 32  ;;  %p727_p11 = scmp.lt.s32.totalorder %s455_s22, %s455_s22 }
  0x4b   :  { %620 = vmatprep.subr.bf16.mxu1 %v779_v1  ;;  %p723_p10 = scmp.ne.s32.totalorder %s455_s22, %s722_s23  ;;  %p728_p12 = scmp.lt.s32.totalorder %s722_s23, %s722_s23 }
  0x4c   :  { %591 = vmatpush3.bf16.msra.mxu0 %v588_v25 }
  0x4d   :  { %593 = vmatprep.subr.bf16.mxu0 %v592_v32  ;;  %p729_p13 = por %p728_p12, %p727_p11 }
  0x4e   :  { %622 = vmatpush3.bf16.msra.mxu1 %v621_v33 }
  0x4f   :  { %623 = vmatprep.subr.bf16.mxu1 %v779_v1  ;;  %p730_p0 = pnand %p729_p13, %p723_p10 }
  0x50   :  { %595 = vmatpush3.bf16.msra.mxu0 %v592_v32 }
  0x51   :  { %597 = vmatprep.subr.bf16.mxu0 %v596_v38 }
  0x52   :  { %625 = vmatpush3.bf16.msra.mxu1 %v624_v39 }
  0x53   :  { %626 = vmatprep.subr.bf16.mxu1 %v779_v1 }
  0x54   :  { %599 = vmatpush3.bf16.msra.mxu0 %v596_v38 }
  0x55   :  { %601 = vmatprep.subr.bf16.mxu0 %v600_v44 }
  0x56   :  { %628 = vmatpush3.bf16.msra.mxu1 %v627_v45 }
  0x57   :  { %629 = vmatprep.subr.bf16.mxu1 %v779_v1 }
  0x58   :  { %603 = vmatpush3.bf16.msra.mxu0 %v600_v44 }
  0x59   :  { %605 = vmatprep.subr.bf16.mxu0 %v604_v50 }
  0x5a   :  { %631 = vmatpush3.bf16.msra.mxu1 %v630_v51 }
  0x5c   :  { %607 = vmatpush3.bf16.msra.mxu0 %v604_v50 }
  0x5d   :  { %574 = vmatmul.mubr.f32.vlgmr.msra.gmra.mrb[0].mxu1 %v166_v52 }
  0x5f   :  { %539 = vmatmul.mubr.f32.vlgmr.msra.gmra.mrb[0].mxu0 %v900_v53 }
  0xc5   :  { %v318_v19 = vpop.permute.xlu1 %317 }
 0x130   :  { %v256_v63 = vpop.f32.mrb[0].mxu1 }
 0x131   :  { %v257_v0 = vadd.f32 %v468_v61, %v256_v63  ;;  %v575_v1 = vpop.f32.mrb[1].mxu1 }
 0x132   :  { %v540_v2 = vpop.f32.mrb[0].mxu0 }
 0x133   :  { %v267_v3 = vrot.slane %v257_v0, %v266_v62  ;;  %v157_v5 = vpop.f32.mrb[1].mxu0 }
 0x135   :  { %v268_v6 = vcombine.high %v267_v3, %v267_v3  ;;  %v275_v7 = vrot.slane %v267_v3, %v266_v62 }
 0x137   :  { %v282_v8 = vrot.slane %v268_v6, %v266_v62  ;;  %v286_v9 = vrot.slane %v275_v7, %v285_v4 }
 0x139   :  { %v290_v10 = vrot.slane %v282_v8, %v285_v4  ;;  %v293_v11 = vadd.f32 %v286_v9, %v157_v5 }
 0x13b   :  { %v294_v12 = vadd.f32 %v540_v2, %v290_v10  ;;  %646 = vtanh.f32 %v293_v11 }
 0x13d   :  { %648 = vtanh.f32 %v294_v12 }
 0x145   :  { %v647_v14 = vpop.eup %646 }
 0x146   :  { %v304_v15 = vmul.f32 %v647_v14, %v469_v13 }
 0x147   :  { %v649_v16 = vpop.eup %648 }
 0x148   :  { %306 = vadd.xlane.f32.xlu0 %v304_v15  ;;  %v305_v17 = vmul.f32 %v649_v16, %v469_v13 }
 0x14c   :  { %308 = vadd.xlane.f32.xlu0 %v305_v17 }
 0x1d5   :  { %v307_v20 = vpop.xlane.xlu0 %306 }
 0x1d6   :  { %v320_v22 = vadd.f32 %v318_v19, %v307_v20 }
 0x1d8   :  { %v329_v25 = vrot.slane %v320_v22, %v328_v21 }
 0x1d9   :  { %v309_v23 = vpop.xlane.xlu0 %308 }
 0x1da   :  { %v321_v24 = vadd.f32 %v318_v19, %v309_v23 }
 0x1dc   :  { %v333_v26 = vrot.slane %v321_v24, %v328_v21 }
 0x1de   :  { %v335_v27 = vsel %vm334_vm1, %v333_v26, %v329_v25 }
 0x1df   :  { %v338_v28 = vsel %vm337_vm2, %v335_v27, -inf }
 0x1e0   :  { %339 = vmax.xlane.f32.xlu1 %v338_v28 }
 0x26d   :  { %v340_v31 = vpop.xlane.xlu1 %339 }
 0x26e   :  { %v345_v32 = vrot.slane %v340_v31, %v285_v4  ;;  %v349_v33 = vrot.slane %v340_v31, %v348_v30 }
 0x270   :  { %v352_v34 = vsub.f32 %v320_v22, %v345_v32  ;;  %v353_v35 = vsub.f32 %v321_v24, %v349_v33 }
 0x272   :  { %v354_v36 = vmul.f32 1.442695, %v352_v34  ;;  %v356_v37 = vmul.f32 1.442695, %v353_v35 }
 0x274   :  { %650 = vpow2.f32 %v354_v36 }
 0x275   :  { %652 = vpow2.f32 %v356_v37 }
 0x27e   :  { %v651_v38 = vpop.eup %650 }
 0x27f   :  { %v653_v39 = vpop.eup %652  ;;  %361 = vperm.xlu0 %645, %v651_v38  }
 0x280   :  { %364 = vperm.xlu1 %644, %v653_v39  }
 0x2fe   :  { %v362_v40 = vpop.permute.xlu0 %361 }
 0x2ff   :  { %v365_v41 = vpop.permute.xlu1 %364  ;;  %v369_v42 = vrot.slane %v362_v40, %v328_v21 }
 0x300   :  { %v373_v43 = vrot.slane %v365_v41, %v328_v21 }
 0x302   :  { %v374_v44 = vsel %vm334_vm1, %v373_v43, %v369_v42 }
 0x303   :  { %v376_v45 = vsel %vm337_vm2, %v374_v44, 0.0 }
 0x304   :  { %377 = vadd.xlane.f32.xlu0 %v376_v45 }
 0x391   :  { %v378_v46 = vpop.xlane.xlu0 %377 }
 0x392   :  { %654 = vrcp.f32 %v378_v46 }
 0x39c   :  { %v655_v47 = vpop.eup %654 }
 0x39d   :  { %v380_v48 = vmul.f32 %v655_v47, %v378_v46 }
 0x39f   :  { %v381_v49 = vsub.f32 2.0, %v380_v48 }
 0x3a1   :  { %v382_v50 = vmul.f32 %v655_v47, %v381_v49 }
 0x3a3   :  { %v387_v51 = vrot.slane %v382_v50, %v285_v4  ;;  %v391_v52 = vrot.slane %v382_v50, %v348_v30 }
 0x3a5   :  { %v394_v54 = vmul.f32 %v651_v38, %v387_v51  ;;  %v395_v55 = vmul.f32 %v653_v39, %v391_v52 }
 0x3a7   :  { %398 = vperm.xlu1 %644, %v394_v54  }
 0x3ab   :  { %403 = vperm.xlu1 %644, %v395_v55  }
 0x426   :  { %v399_v56 = vpop.permute.xlu1 %398 }
 0x427   :  { %v406_v57 = vmul.f32 %v399_v56, %v889_v29  ;;  %v428_v61 = vrot.slane %v399_v56, %v328_v21 }
 0x429   :  { %v408_v58 = vrot.slane %v406_v57, 4 }
 0x42a   :  { %v404_v59 = vpop.permute.xlu1 %403 }
 0x42b   :  { %v409_v60 = vadd.f32 %v408_v58, %v406_v57  ;;  %v407_v62 = vmul.f32 %v404_v59, %v900_v53  ;;  %v432_v63 = vrot.slane %v404_v59, %v328_v21 }
 0x42d   :  { %v410_v0 = vrot.slane %v409_v60, 2  ;;  %v414_v1 = vrot.slane %v407_v62, 4  ;;  %v433_v2 = vsel %vm334_vm1, %v432_v63, %v428_v61 }
 0x42e   :  { %v436_v3 = vsel %vm435_vm3, %v433_v2, 0.0 }
 0x42f   :  { %v411_v4 = vadd.f32 %v410_v0, %v409_v60  ;;  %v415_v5 = vadd.f32 %v414_v1, %v407_v62  ;;  %437 = vst [vmem:[#allocation10] sm:$0x3] %v436_v3 }
 0x430   :  { %733 = shalt.err (!%p730_p0)
}
 0x431   :  { %s734_s26 = scalar_lea.hbm %s955_s8, 32 }
 0x432   :  { %p735_p1 = scmp.ne.s32.totalorder %s955_s8, %s734_s26  ;;  %p738_p2 = scmp.lt.u32.totalorder %s734_s26, %s955_s8 }
 0x434   :  { %p740_p3 = pnand %p738_p2, %p735_p1 }
 0x436   :  { %743 = shalt.err (!%p740_p3)
}
 0x437   :  { %457 = dma.vmem_to_hbm [thread:$0]  %s455_s22, 32, %s955_s8, [#allocation11]   ;;  %v416_v29 = vrot.slane %v415_v5, 2  ;;  %v412_v53 = vrot.slane %v411_v4, 1 }
 0x438   :  { %s785_s11 = smov [#allocation9]  }
 0x439   :  { %v417_v6 = vadd.f32 %v416_v29, %v415_v5  ;;  %s444_s12 = sshll.u32 %s785_s11, 4  ;;  %v413_v9 = vadd.f32 %v412_v53, %v411_v4  ;;  %s445_s12 = int_to_ptr.vmem [resolvable:$true] %s444_s12 }
 0x43a   :  { %s744_s13 = scalar_lea.vmem %s445_s12, 32  ;;  %p749_p5 = scmp.lt.s32.totalorder %s445_s12, %s445_s12 }
 0x43b   :  { %v418_v7 = vrot.slane %v417_v6, 1  ;;  %p745_p4 = scmp.ne.s32.totalorder %s445_s12, %s744_s13  ;;  %p750_p6 = scmp.lt.s32.totalorder %s744_s13, %s744_s13 }
 0x43d   :  { %v419_v8 = vadd.f32 %v418_v7, %v417_v6  ;;  %p751_p7 = por %p750_p6, %p749_p5 }
 0x43f   :  { %v422_v10 = vsel %vm334_vm1, %v419_v8, %v413_v9  ;;  %p752_p8 = pnand %p751_p7, %p745_p4 }
 0x440   :  { %424 = vst [vmem:[#allocation9] sm:$0x3] %v422_v10 }
 0x441   :  { %755 = shalt.err (!%p752_p8)
}
 0x442   :  { %s756_s15 = scalar_lea.hbm %s954_s7, 32 }
 0x443   :  { %p757_p9 = scmp.ne.s32.totalorder %s954_s7, %s756_s15  ;;  %p760_p10 = scmp.lt.u32.totalorder %s756_s15, %s954_s7 }
 0x445   :  { %p762_p11 = pnand %p760_p10, %p757_p9 }
 0x447   :  { %765 = shalt.err (!%p762_p11)
}
 0x448   :  { %447 = dma.vmem_to_hbm [thread:$0]  %s445_s12, 32, %s954_s7, [#allocation5]  }
 0x449   :  { %770 = dma.done.wait [#allocation5], 32  }
 0x44a   :  { %771 = vsyncadd [#allocation5], 4294967264 }
 0x44b   :  { %772 = dma.done.wait [#allocation11], 32  }
 0x44c   :  { %773 = vsyncadd [#allocation11], 4294967264 }
 0x44d   :  { %464 = vsyncpa [#allocation4], 1 }
 0x44e   :  { %465 = vsyncpa [#allocation7], 1 }
 0x44f   :  { %466 = vsyncpa [#allocation5], 1 }
 0x450   :  { %467 = vsyncpa [#allocation11], 1 }

</bundles_post_ra>
